<compile_context>
chip_gen: v6e
topology: v6e:2x2x1
jax: 0.10.0
libtpu: 0.0.40
codegen_flags: <defaults>
</compile_context>

<pallas_src>
import jax
import jax.numpy as jnp
from jax.experimental import pallas as pl
from jax.experimental.pallas import tpu as pltpu


def _conv_bn_relu_kernel(x_ref, w_ref, b_ref, o_ref):
    """Conv1d(k=3, pad=1) + folded-BN bias + ReLU for one batch block.

    x_ref: (B_blk, C_in, L)   input block, caller dtype (f32)
    w_ref: (3, C_out, C_in)   BN-scale-folded per-tap weights, compute dtype
    b_ref: (C_out, 1)         BN-folded bias, f32
    o_ref: (B_blk, C_out, L)  output block, f32 (final layout, no post-transpose)
    """
    cdt = w_ref.dtype
    b_blk, c_in, L = x_ref.shape

    # Lane index, used to zero the wrap-around column of each rolled tap.
    # These zeros are exactly the conv's `padding=1` zeros.
    lane = jax.lax.broadcasted_iota(jnp.int32, (c_in, L), 1)

    w0 = w_ref[0]          # tap multiplying x[l-1]
    w1 = w_ref[1]          # tap multiplying x[l]
    w2 = w_ref[2]          # tap multiplying x[l+1]
    bias = b_ref[...]      # (C_out, 1), f32

    for b in range(b_blk):                                   # static unroll, b_blk small
        x1 = x_ref[b].astype(cdt)                            # (C_in, L)
        # x0[ci, l] = x[ci, l-1], zero at l == 0
        x0 = jnp.where(lane == 0, jnp.zeros_like(x1),
                       pltpu.roll(x1, shift=1, axis=1))
        # x2[ci, l] = x[ci, l+1], zero at l == L-1
        x2 = jnp.where(lane == L - 1, jnp.zeros_like(x1),
                       pltpu.roll(x1, shift=L - 1, axis=1))
        acc = jnp.dot(w1, x1, preferred_element_type=jnp.float32)
        acc += jnp.dot(w0, x0, preferred_element_type=jnp.float32)
        acc += jnp.dot(w2, x2, preferred_element_type=jnp.float32)
        o_ref[b] = jnp.maximum(acc + bias, 0.0).astype(o_ref.dtype)


def _vmem_budget_bytes():
    """Per-step budget for the double-buffered activation blocks (generation-aware)."""
    try:
        cap = int(pltpu.get_tpu_info().vmem_capacity_bytes)
    except Exception:
        cap = 64 << 20                       # assume the smallest (v7x per-core VMEM)
    # Leave ample headroom for weights, accumulators and compiler scratch.
    return max(4 << 20, cap // 8)


def _pick_batch_block(n, c_in, c_out, l, in_bytes, out_bytes, vmem_budget,
                      max_block=8):
    """Batch elements per grid step.

    Fits the VMEM budget (double-buffered in+out blocks), divides N exactly
    (no padding copies), and keeps >= 2 grid steps so both v7x TensorCores
    get work on the 'parallel' axis.
    """
    per_elem = 2 * l * (c_in * in_bytes + c_out * out_bytes)     # double-buffered
    b = max(1, min(n, max_block, vmem_budget // max(per_elem, 1)))
    while b > 1 and (n % b != 0 or n // b < 2):
        b -= 1
    return b


def conv_trans_bn(x, w, b_conv, gamma, beta, run_mean, run_var,
                  eps=1e-5, compute_dtype=jnp.bfloat16, batch_block=None):
    """x: (N, C_in, L), w: (C_out, C_in, 3) -> (N, C_out, L) f32 (inference-mode BN)."""
    N, C_in, L = x.shape
    C_out = w.shape[0]

    # ---- Fold BatchNorm (running stats) into the conv weight / bias. -------------
    scale = gamma / jnp.sqrt(run_var + eps)                               # (C_out,)
    w_folded = w.astype(jnp.float32) * scale[:, None, None]               # (C_out, C_in, 3)
    bias = ((b_conv - run_mean) * scale + beta).astype(jnp.float32)       # (C_out,)
    bias = bias.reshape(C_out, 1)
    # Per-tap weight matrices: w_taps[k] multiplies x[l + k - 1].
    w_taps = jnp.transpose(w_folded, (2, 0, 1)).astype(compute_dtype)     # (3, C_out, C_in)

    # ---- Blocking over the batch axis (x / out keep their native layout). --------
    in_bytes = x.dtype.itemsize
    cdt_bytes = jnp.dtype(compute_dtype).itemsize
    if batch_block is None:
        batch_block = _pick_batch_block(
            N, C_in, C_out, L, in_bytes=in_bytes, out_bytes=4,
            vmem_budget=_vmem_budget_bytes())
    batch_block = max(1, min(batch_block, N))
    while N % batch_block != 0:                                  # must divide N exactly
        batch_block -= 1
    G = N // batch_block

    # Honest VMEM footprint: double-buffered activation blocks + single-buffered
    # (Buffered(1)) weights/bias + f32 accumulator headroom.
    vmem_needed = (2 * batch_block * L * (C_in * in_bytes + C_out * 4)
                   + 3 * C_out * C_in * cdt_bytes
                   + C_out * 4
                   + C_out * L * 4)
    vmem_limit = int(min(64 << 20, max(2 * vmem_needed, 16 << 20)))

    out = pl.pallas_call(
        _conv_bn_relu_kernel,
        out_shape=jax.ShapeDtypeStruct((N, C_out, L), jnp.float32),
        grid=(G,),
        in_specs=[
            pl.BlockSpec((batch_block, C_in, L), lambda g: (g, 0, 0)),
            pl.BlockSpec((3, C_out, C_in), lambda g: (0, 0, 0),
                         pipeline_mode=pl.Buffered(1)),
            pl.BlockSpec((C_out, 1), lambda g: (0, 0),
                         pipeline_mode=pl.Buffered(1)),
        ],
        out_specs=pl.BlockSpec((batch_block, C_out, L), lambda g: (g, 0, 0)),
        compiler_params=pltpu.CompilerParams(
            dimension_semantics=("parallel",),
            vmem_limit_bytes=vmem_limit,
        ),
    )(x, w_taps, bias)
    return out


def _reference(x, w, b_conv, gamma, beta, run_mean, run_var, eps=1e-5):
    # Plain-JAX reference of the PyTorch forward (inference-mode BN).
    out = jax.lax.conv_general_dilated(
        x, w, window_strides=(1,), padding=((1, 1),),
        dimension_numbers=("NCH", "OIH", "NCH"),
        precision=jax.lax.Precision.HIGHEST,
    ) + b_conv[None, :, None]
    out = (out - run_mean[None, :, None]) / jnp.sqrt(run_var[None, :, None] + eps)
    out = out * gamma[None, :, None] + beta[None, :, None]
    return jnp.maximum(out, 0.0)


if __name__ == "__main__":
    N, C_in, C_out, L = 2, 4, 8, 16

    key = jax.random.PRNGKey(0)
    k_x, k_w, k_b, k_g, k_be, k_m, k_v = jax.random.split(key, 7)

    x = jax.random.normal(k_x, (N, C_in, L), dtype=jnp.float32)
    w = jax.random.normal(k_w, (C_out, C_in, 3), dtype=jnp.float32) * 0.3
    b_conv = jax.random.normal(k_b, (C_out,), dtype=jnp.float32) * 0.1
    gamma = 1.0 + 0.1 * jax.random.normal(k_g, (C_out,), dtype=jnp.float32)
    beta = 0.1 * jax.random.normal(k_be, (C_out,), dtype=jnp.float32)
    run_mean = 0.1 * jax.random.normal(k_m, (C_out,), dtype=jnp.float32)
    run_var = jnp.abs(jax.random.normal(k_v, (C_out,), dtype=jnp.float32)) + 0.5

    ref = _reference(x, w, b_conv, gamma, beta, run_mean, run_var)

    # f32 compute path: tight structural check against the reference.
    out_f32 = jax.block_until_ready(conv_trans_bn(
        x, w, b_conv, gamma, beta, run_mean, run_var,
        compute_dtype=jnp.float32))
    assert out_f32.shape == (N, C_out, L)
    assert jnp.allclose(out_f32, ref, atol=1e-3, rtol=1e-3), float(
        jnp.max(jnp.abs(out_f32 - ref)))

    # Default bf16 MXU-operand path (f32 accumulate + f32 epilogue): loose check.
    out_bf16 = jax.block_until_ready(conv_trans_bn(
        x, w, b_conv, gamma, beta, run_mean, run_var))
    assert out_bf16.shape == (N, C_out, L)
    assert jnp.allclose(out_bf16, ref, atol=1e-1, rtol=1e-1), float(
        jnp.max(jnp.abs(out_bf16 - ref)))

    print("KERNEL_OK")
</pallas_src>

<mosaic_0001>
module attributes {stable_mosaic.version = 11 : i64} {
  func.func @_conv_bn_relu_kernel(%arg0: i32, %arg1: memref<1x4x16xf32, #tpu.memory_space<vmem>>, %arg2: memref<3x8x4xf32, #tpu.memory_space<vmem>>, %arg3: memref<8x1xf32, #tpu.memory_space<vmem>>, %arg4: memref<1x8x16xf32, #tpu.memory_space<vmem>>) attributes {dimension_semantics = [#tpu.dimension_semantics<parallel>], iteration_bounds = array<i64: 2>, scalar_prefetch = 0 : i64, scratch_operands = 0 : i64, tpu.core_type = #tpu.core_type<tc>, window_params = [{transform_indices = @transform_0, window_bounds = array<i64: 1, 4, 16>}, {pipeline_mode = #tpu.pipeline_mode<synchronous>, transform_indices = @transform_1, window_bounds = array<i64: 3, 8, 4>}, {pipeline_mode = #tpu.pipeline_mode<synchronous>, transform_indices = @transform_2, window_bounds = array<i64: 8, 1>}, {transform_indices = @transform_3, window_bounds = array<i64: 1, 8, 16>}]} {
    %0 = tpu.iota {dimensions = array<i32: 1>} : vector<4x16xi32>
    %c0 = arith.constant 0 : index
    %c0_0 = arith.constant 0 : index
    %c0_1 = arith.constant 0 : index
    %1 = vector.load %arg2[%c0, %c0_0, %c0_1] : memref<3x8x4xf32, #tpu.memory_space<vmem>>, vector<1x8x4xf32>
    %2 = vector.shape_cast %1 : vector<1x8x4xf32> to vector<8x4xf32>
    %c1 = arith.constant 1 : index
    %c0_2 = arith.constant 0 : index
    %c0_3 = arith.constant 0 : index
    %3 = vector.load %arg2[%c1, %c0_2, %c0_3] : memref<3x8x4xf32, #tpu.memory_space<vmem>>, vector<1x8x4xf32>
    %4 = vector.shape_cast %3 : vector<1x8x4xf32> to vector<8x4xf32>
    %c2 = arith.constant 2 : index
    %c0_4 = arith.constant 0 : index
    %c0_5 = arith.constant 0 : index
    %5 = vector.load %arg2[%c2, %c0_4, %c0_5] : memref<3x8x4xf32, #tpu.memory_space<vmem>>, vector<1x8x4xf32>
    %6 = vector.shape_cast %5 : vector<1x8x4xf32> to vector<8x4xf32>
    %c0_6 = arith.constant 0 : index
    %c0_7 = arith.constant 0 : index
    %7 = vector.load %arg3[%c0_6, %c0_7] : memref<8x1xf32, #tpu.memory_space<vmem>>, vector<8x1xf32>
    %c0_8 = arith.constant 0 : index
    %c0_9 = arith.constant 0 : index
    %c0_10 = arith.constant 0 : index
    %8 = vector.load %arg1[%c0_8, %c0_9, %c0_10] : memref<1x4x16xf32, #tpu.memory_space<vmem>>, vector<1x4x16xf32>
    %9 = vector.shape_cast %8 : vector<1x4x16xf32> to vector<4x16xf32>
    %c0_i32 = arith.constant 0 : i32
    %10 = vector.broadcast %c0_i32 : i32 to vector<4x16xi32>
    %11 = arith.cmpi eq, %0, %10 : vector<4x16xi32>
    %cst = arith.constant 0.000000e+00 : f32
    %12 = vector.broadcast %cst : f32 to vector<4x16xf32>
    %c1_i32 = arith.constant 1 : i32
    %13 = tpu.dynamic_rotate %9 by %c1_i32 dim 1 : vector<4x16xf32>, i32 -> vector<4x16xf32>
    %14 = arith.select %11, %12, %13 : vector<4x16xi1>, vector<4x16xf32>
    %c15_i32 = arith.constant 15 : i32
    %15 = vector.broadcast %c15_i32 : i32 to vector<4x16xi32>
    %16 = arith.cmpi eq, %0, %15 : vector<4x16xi32>
    %cst_11 = arith.constant 0.000000e+00 : f32
    %17 = vector.broadcast %cst_11 : f32 to vector<4x16xf32>
    %c15_i32_12 = arith.constant 15 : i32
    %18 = tpu.dynamic_rotate %9 by %c15_i32_12 dim 1 : vector<4x16xf32>, i32 -> vector<4x16xf32>
    %19 = arith.select %16, %17, %18 : vector<4x16xi1>, vector<4x16xf32>
    %cst_13 = arith.constant dense<0.000000e+00> : vector<8x16xf32>
    %20 = tpu.matmul %4, %9, %cst_13 {dimension_numbers = #tpu.dot_dimension_numbers<[1], [0], [0], [1], [0, 0, 1, 1], [], []>} : vector<8x4xf32>, vector<4x16xf32>, vector<8x16xf32> -> vector<8x16xf32>
    %cst_14 = arith.constant dense<0.000000e+00> : vector<8x16xf32>
    %21 = tpu.matmul %2, %14, %cst_14 {dimension_numbers = #tpu.dot_dimension_numbers<[1], [0], [0], [1], [0, 0, 1, 1], [], []>} : vector<8x4xf32>, vector<4x16xf32>, vector<8x16xf32> -> vector<8x16xf32>
    %22 = arith.addf %20, %21 : vector<8x16xf32>
    %cst_15 = arith.constant dense<0.000000e+00> : vector<8x16xf32>
    %23 = tpu.matmul %6, %19, %cst_15 {dimension_numbers = #tpu.dot_dimension_numbers<[1], [0], [0], [1], [0, 0, 1, 1], [], []>} : vector<8x4xf32>, vector<4x16xf32>, vector<8x16xf32> -> vector<8x16xf32>
    %24 = arith.addf %22, %23 : vector<8x16xf32>
    %25 = vector.broadcast %7 : vector<8x1xf32> to vector<8x16xf32>
    %26 = arith.addf %24, %25 : vector<8x16xf32>
    %cst_16 = arith.constant 0.000000e+00 : f32
    %27 = vector.broadcast %cst_16 : f32 to vector<8x16xf32>
    %28 = arith.maximumf %26, %27 : vector<8x16xf32>
    %c0_17 = arith.constant 0 : index
    %c0_18 = arith.constant 0 : index
    %c0_19 = arith.constant 0 : index
    %29 = vector.load %arg4[%c0_17, %c0_18, %c0_19] : memref<1x8x16xf32, #tpu.memory_space<vmem>>, vector<1x8x16xf32>
    %30 = vector.shape_cast %29 : vector<1x8x16xf32> to vector<8x16xf32>
    %31 = vector.shape_cast %28 : vector<8x16xf32> to vector<1x8x16xf32>
    tpu.vector_store %arg4[%c0_17, %c0_18, %c0_19], %31 {strides = array<i32>} : memref<1x8x16xf32, #tpu.memory_space<vmem>>, vector<1x8x16xf32>,
    return
  }
  func.func @transform_0(%arg0: i32) -> (i32, i32, i32) {
    %c0_i32 = arith.constant 0 : i32
    %c0_i32_0 = arith.constant 0 : i32
    %c0_i32_1 = arith.constant 0 : i32
    return %arg0, %c0_i32, %c0_i32_0 : i32, i32, i32
  }
  func.func @transform_1(%arg0: i32) -> (i32, i32, i32) {
    %c0_i32 = arith.constant 0 : i32
    %c0_i32_0 = arith.constant 0 : i32
    %c0_i32_1 = arith.constant 0 : i32
    %c0_i32_2 = arith.constant 0 : i32
    return %c0_i32, %c0_i32_0, %c0_i32_1 : i32, i32, i32
  }
  func.func @transform_2(%arg0: i32) -> (i32, i32) {
    %c0_i32 = arith.constant 0 : i32
    %c0_i32_0 = arith.constant 0 : i32
    %c0_i32_1 = arith.constant 0 : i32
    return %c0_i32, %c0_i32_0 : i32, i32
  }
  func.func @transform_3(%arg0: i32) -> (i32, i32, i32) {
    %c0_i32 = arith.constant 0 : i32
    %c0_i32_0 = arith.constant 0 : i32
    %c0_i32_1 = arith.constant 0 : i32
    return %arg0, %c0_i32, %c0_i32_0 : i32, i32, i32
  }
}

</mosaic_0001>

<bundles_post_ra>
// kernel: tpu_custom_call.1
= control target key start
LH: loop header
LB: loop body
LE: loop exit
PB: predicated region body
PF: predicated region fallthrough
CT: control target
= control target key end

     0   :  { %8 = vsyncpa [#allocation3], 0  ;;  %s790_s0 = inlined_call_operand.vmem [shape: f32[2,4,16], index: 0, kind: input, shape index: {}]   ;;  %s791_s1 = inlined_call_operand.vmem [shape: f32[3,8,4], index: 1, kind: input, shape index: {}]   ;;  %s792_s2 = inlined_call_operand.vmem [shape: f32[8,1], index: 2, kind: input, shape index: {}]   ;;  %s793_s3 = inlined_call_operand.hbm [shape: f32[2,8,16], index: 3, kind: output, shape index: {}]  }
   0x1   :  { %10 = vsyncpa [#allocation3 + $0x1], 0  ;;  %s680_s12 = smov 0   ;;  %s682_s13 = smov 0  }
   0x2   :  { %s684_s14 = smov 0   ;;  %s686_s15 = smov 0  }
   0x3 LB: > { %s701_s16 = sadd.s32 4294967295, %s651_s15   ;;  %s506_s17 = sadd.s32 4294967294, %s651_s15   ;;  %s651_s15 = sphi %s686_s15, %s799_s15   ;;  %s647_s14 = sphi %s684_s14, %s798_s14   ;;  %s643_s13 = sphi %s682_s13, %s797_s13   ;;  %s639_s12 = sphi %s680_s12, %s796_s12  }
   0x4   : > { %s705_s18 = sadd.s32 1, %s651_s15   ;;  %s91_s19 = sadd.s32 1, %s647_s14 }
   0x5   : > { %s88_s20 = ssub.s32 %s651_s15, %s705_s18  ;;  %p101_p0 = scmp.ne.s32.totalorder %s647_s14, %s643_s13 }
   0x6   : > { %p89_p1 = scmp.eq.s32.totalorder %s88_s20, 0  ;;  %p102_p2 = scmp.eq.s32.totalorder %s701_s16, 1 }
   0x7   : > { %p107_p3 = scmp.ne.s32.totalorder %s643_s13, %s639_s12  ;;  %p108_p4 = scmp.eq.s32.totalorder %s506_s17, 1 }
   0x8   : > { %s716_s21 = scalar_select %p89_p1, %s647_s14, %s91_s19  }
   0x9   : > { %p718_p5 = por %p102_p2, %p101_p0  ;;  %p722_p6 = por %p108_p4, %p107_p3 }
   0xa   : > { %p509_p7 = scmp.ge.s32.totalorder %s651_s15, 1  ;;  %p139_p8 = scmp.lt.s32.totalorder %s651_s15, 3 }
   0xc   : > { %p140_p9 = pnand %p509_p7, %p139_p8 }
   0xd   : > { %p162_p10 = scmp.lt.s32.totalorder (!%p140_p9), %s701_s16, 1  ;;  %s653_s29 = smov (!%p140_p9), 16  }
   0xe   : > { %143 = sbr.rel (%p140_p9) target bundleno = 589 (0x24d), region = 32  ;;  %s657_s7 = smov (!%p140_p9), 113  }
   0xf   : > { %s658_s8 = smov (!%p140_p9), 127   ;;  %s159_s19 = sand.u32 (!%p140_p9), 1, %s643_s13  }
  0x10   : > { %s510_s20 = sshll.u32 (!%p140_p9), %s159_s19, 3  ;;  %s434_s30 = scalar_lea.sflag (!%p140_p9), [#allocation3], %s159_s19 }
  0x11   : > { %s659_s5 = smov (!%p140_p9), [#allocation2]  }
  0x12   : > { %s595_s6 = sshll.u32 (!%p140_p9), %s659_s5, 4  ;;  %s596_s6 = int_to_ptr.vmem [resolvable:$false] %s595_s6 }
  0x13   : > { %s163_s24 = scalar_select %p162_p10, %s701_s16, 1  ;;  %vm176_vm0 = vcmask 1047680   ;;  %v654_v3 = vmov 0.0   ;;  %vm197_vm1 = vcmask 1043456   ;;  %vm655_vm2 = vmmov 0   ;;  %v512_v4 = vld [vmem:[%s791_s1 + $0x8] sm:$0xff] }
  0x14   : > { %530 = vmatprep.subr.mxu0 %v654_v3  ;;  %535 = vmatprep.subr.mxu1 %v654_v3  ;;  %vm193_vm3 = vcmask 31744   ;;  %v173_v5 = vld [vmem:[%s792_s2] sm:$0xff]  ;;  %v656_v6 = vmov 0   ;;  %v166_v9 = vlaneseq  ;;  %v513_v15 = vld [vmem:[%s791_s1 + $0x10] sm:$0xff]  ;;  %vm431_vm6 = vcmask 130048  }
  0x15   : > { %s511_s25 = sshll.u32 %s163_s24, 2  ;;  %532 = vmatprep.mubr.msk.f32.mxu0 %vm655_vm2, %v654_v3  ;;  %537 = vmatprep.mubr.msk.f32.mxu1 %vm655_vm2, %v654_v3  ;;  %v168_v12 = vld [vmem:[%s791_s1] sm:$0xff]  ;;  %s521_s24 = sshll.u32 %s701_s16, 7 }
  0x16   : > { %s165_s28 = scalar_lea.vmem %s790_s0, %s511_s25  ;;  %590 = vset.pattern.permute.xlu0 %v656_v6  ;;  %v167_v10 = vand.u32 127, %v166_v9  ;;  %s161_s25 = scalar_lea.vmem [#allocation2], %s510_s20 }
  0x17   : > { %v174_v0 = vld [vmem:[%s165_s28] sm:$0xf]  ;;  %s447_s26 = sshll.u32 %s161_s25, 4  ;;  %s597_s16 = scalar_lea.vmem %s596_s6, 256  ;;  %s448_s26 = int_to_ptr.vmem [resolvable:$true] %s447_s26 }
  0x18   : > { %177 = vrot.lane.b32.xlu0 %v174_v0, %s653_s29  ;;  %536 = vmatpush3.msk.msra.mxu1 %vm197_vm1, %v174_v0  ;;  %vm175_vm4 = vcmp.eq.s32.totalorder %v167_v10, 0  ;;  %vm188_vm5 = vcmp.eq.s32.totalorder %v167_v10, 15  ;;  %s591_s4 = scalar_lea.vmem %s448_s26, 128  ;;  %p598_p0 = scmp.lt.s32.totalorder %s448_s26, %s596_s6 }
  0x19   : > { %538 = vmatmul.mubr.msk.f32.vlgmr.msra.gmra.mxu1 %vm193_vm3, %v512_v4  ;;  %p592_p11 = scmp.ne.s32.totalorder %s448_s26, %s591_s4  ;;  %p599_p1 = scmp.lt.s32.totalorder %s597_s16, %s591_s4 }
  0x1b   : > { %p593_p12 = pnand %p592_p11, %p718_p5  ;;  %p600_p2 = por %p599_p1, %p598_p0 }
  0x1d   : > { %p594_p13 = pneg %p593_p12 }
  0x1f   : > { %p601_p3 = pnand %p600_p2, %p594_p13 }
  0x8a   : > { %v178_v1 = vpop.permute.xlu0 %177 }
  0x8b   : > { %v179_v2 = vsel %vm176_vm0, %v178_v1, %v174_v0 }
  0x8c   : > { %180 = vrot.lane.b32.xlu0 %v179_v2, %s653_s29  ;;  %s445_s29 = scalar_lea.hbm %s793_s3, %s521_s24 }
  0x90   : > { %426 = vperm.xlu0 %590, %v173_v5  }
  0xd9   : > { %v343_v17 = vpop.f32.mrf.mxu1 }
  0xdb   : > { %v539_v18 = vpop.f32.mrf.mxu1 }
  0xfe   : > { %v181_v7 = vpop.permute.xlu0 %180 }
  0xff   : > { %v182_v8 = vsel %vm176_vm0, %v181_v7, %v174_v0 }
 0x100   : > { %184 = vrot.lane.b32.xlu1 %v182_v8, %s657_s7 }
 0x104   : > { %189 = vrot.lane.b32.xlu1 %v182_v8, %s658_s8 }
 0x10b   : > { %v427_v23 = vpop.permute.xlu0 %426 }
 0x172   : > { %v185_v11 = vpop.permute.xlu1 %184 }
 0x173   : > { %v187_v13 = vsel %vm175_vm4, 0.0, %v185_v11 }
 0x174   : > { %531 = vmatpush3.msk.msra.mxu0 %vm197_vm1, %v187_v13 }
 0x175   : > { %533 = vmatmul.mubr.msk.f32.vlgmr.msra.gmra.mxu0 %vm193_vm3, %v168_v12  ;;  %540 = vmatprep.subr.mxu0 %v654_v3 }
 0x176   : > { %v190_v14 = vpop.permute.xlu1 %189  ;;  %542 = vmatprep.mubr.msk.f32.mxu0 %vm655_vm2, %v654_v3 }
 0x177   : > { %v192_v16 = vsel %vm188_vm5, 0.0, %v190_v14 }
 0x178   : > { %541 = vmatpush3.msk.msra.mxu0 %vm197_vm1, %v192_v16 }
 0x179   : > { %543 = vmatmul.mubr.msk.f32.vlgmr.msra.gmra.mxu0 %vm193_vm3, %v513_v15 }
 0x235   : > { %v267_v19 = vpop.f32.mrf.mxu0 }
 0x236   : > { %v344_v21 = vadd.f32 %v343_v17, %v267_v19 }
 0x237   : > { %v534_v20 = vpop.f32.mrf.mxu0 }
 0x239   : > { %v419_v22 = vpop.f32.mrf.mxu0 }
 0x23a   : > { %v423_v24 = vadd.f32 %v419_v22, %v344_v21 }
 0x23b   : > { %v544_v25 = vpop.f32.mrf.mxu0 }
 0x23c   : > { %v429_v26 = vadd.f32 %v427_v23, %v423_v24 }
 0x23e   : > { %v430_v27 = vmax.f32 %v429_v26, 0.0 }
 0x240   : > { %432 = vst.msk [vmem:[%s161_s25] sm:$0xff] %vm431_vm6, %v430_v27 }
 0x241   : > { %604 = shalt.err (!%p601_p3)
}
 0x242   : > { %s605_s7 = scalar_lea.hbm %s445_s29, 128  ;;  %s609_s10 = scalar_lea.hbm %s793_s3, 256 }
 0x243   : > { %p606_p4 = scmp.ne.s32.totalorder %s445_s29, %s605_s7  ;;  %p610_p9 = scmp.lt.s32.totalorder %s445_s29, %s793_s3 }
 0x244   : > { %p611_p10 = scmp.lt.s32.totalorder %s609_s10, %s605_s7 }
 0x245   : > { %p607_p7 = pnand %p606_p4, %p718_p5 }
 0x246   : > { %p612_p11 = por %p611_p10, %p610_p9 }
 0x247   : > { %p608_p8 = pneg %p607_p7 }
 0x249   : > { %p613_p12 = pnand %p612_p11, %p608_p8 }
 0x24b   : > { %616 = shalt.err (!%p613_p12)
}
 0x24c   : > { %545 = dma.vmem_to_hbm [thread:$0]  (%p718_p5), %s448_s26, 128, %s445_s29, %s434_s30  }
 0x24d PF: > { %p551_p13 = scmp.ge.s32.totalorder %s651_s15, 2  ;;  %s459_s19 = sand.u32 1, %s639_s12  }
 0x24e   : > { %s460_s20 = scalar_lea.sflag [#allocation3], %s459_s19 }
 0x24f   : > { %p548_p0 = pnand %p551_p13, %p722_p6 }
 0x251   : > { %p549_p1 = pneg %p548_p0 }
 0x253   : > { %634 = dma.done.wait (%p549_p1), %s460_s20, 128  }
 0x254   : > { %636 = vsyncadd (%p549_p1), %s460_s20, 4294967168  ;;  %p13_p2 = scmp.ge.s32.totalorder %s705_s18, 4   ;;  %s796_s12 = smov %s643_s13 }
 0x255   : > { %s797_s13 = smov %s647_s14  ;;  %s798_s14 = smov %s716_s21 }
 0x256   : > { %s799_s15 = smov %s705_s18  ;;  %15 = sbr.rel (!%p13_p2) target bundleno = 3 (0x3), region = 69 }
 0x25b   :  { %465 = vsyncpa [#allocation3], 1 }
 0x25c   :  { %467 = vsyncpa [#allocation3 + $0x1], 1 }

</bundles_post_ra>
